<compile_context>
chip_gen: v5e
topology: v5e:2x2
jax: 0.10.0
libtpu: 0.0.40
codegen_flags: <defaults>
</compile_context>

<pallas_src>
import jax
import jax.numpy as jnp
from jax import lax
from jax.experimental import pallas as pl
from jax.experimental.pallas import tpu as pltpu


_EPS = 1e-5
_LRELU_SLOPE = 0.2
# Above the 32 MiB default scoped limit (v5e/v6e benefit), below v7x's 64 MiB.
_VMEM_LIMIT = 48 * 1024 * 1024


def _round_up(x, m):
    return (x + m - 1) // m * m


# ------- Phase 1: implicit-GEMM conv (4 taps) + per-sample BN partial stats -------
def _conv_stats_kernel(xs_ref, w_ref, y_ref, stats_ref, acc_ref):
    # xs_ref:    (1, Ho+1, Wo+1, 4*C_in) bf16  space-to-depth input, one sample
    # w_ref:     (4, 4*C_in, C_pad)      bf16  per-tap weights (resident)
    # y_ref:     (1, Ho*Wo, C_pad)       bf16  conv output (lane-dense)
    # stats_ref: (1, 2, C_pad)           f32   [sum, sum-of-squares] over rows
    # acc_ref:   (Ho*Wo, C_pad)          f32   VMEM accumulator scratch
    ho = xs_ref.shape[1] - 1
    wo = xs_ref.shape[2] - 1
    k4 = xs_ref.shape[3]

    acc_ref[...] = jnp.zeros_like(acc_ref)
    for t in range(4):                      # 4 taps of the 2x2 (post-s2d) kernel
        di, dj = t // 2, t % 2
        x_tap = xs_ref[0, di:di + ho, dj:dj + wo, :].reshape(ho * wo, k4)
        acc_ref[...] += jnp.dot(x_tap, w_ref[t],
                                preferred_element_type=jnp.float32)

    acc = acc_ref[...]
    y_ref[0] = acc.astype(y_ref.dtype)                  # bf16 intermediate store
    s = jnp.sum(acc, axis=0, keepdims=True)             # (1, C_pad)
    ss = jnp.sum(acc * acc, axis=0, keepdims=True)      # (1, C_pad)
    stats_ref[0] = jnp.concatenate([s, ss], axis=0)     # (2, C_pad)


# ---------- Phase 2: fused BN affine + LeakyReLU (bf16 in / bf16 out, in place) ----
def _bn_lrelu_kernel(y_ref, scale_ref, shift_ref, o_ref):
    z = y_ref[...].astype(jnp.float32) * scale_ref[...] + shift_ref[...]
    o_ref[...] = jnp.where(z > 0, z, _LRELU_SLOPE * z).astype(o_ref.dtype)


def discriminator_block_forward(x, conv_w, conv_b, bn_gamma, bn_beta):
    """x: (N, C_in, H, W) f32 NCHW.  conv_w: (C_out, C_in, 4, 4).  Returns NCHW f32.

    conv_b is accepted for API parity but unused: a per-channel bias before a
    training-mode BatchNorm is mathematically a no-op.
    """
    del conv_b
    N, C_in, H, W = x.shape
    C_out = conv_w.shape[0]
    # TODO(synk): odd H/W would need a generic (non space-to-depth) conv path.
    assert H % 2 == 0 and W % 2 == 0, "stride-2 4x4 conv path assumes even H, W"
    Ho, Wo = H // 2, W // 2
    Hs, Ws = Ho + 1, Wo + 1            # space-to-depth spatial of the padded input
    K4 = 4 * C_in                      # contraction size per tap
    M = N * Ho * Wo                    # true BN element count per channel

    # Lane-dense output channels; 256-multiples fill the 2x256x256 MXU on v6e/v7x
    # once the layer is big enough to benefit.
    C_pad = _round_up(C_out, 256) if C_out > 128 else _round_up(C_out, 128)

    # ---- wrapper prep (one bf16 pass over the input) ----
    # pad=1, NCHW -> NHWC, space-to-depth by 2:
    #   xs[n, hs, ws, (2a+b)*C_in + c] = x_padded[n, 2*hs+a, 2*ws+b, c]
    xp = jnp.pad(x, ((0, 0), (0, 0), (1, 1), (1, 1))).astype(jnp.bfloat16)
    xp = xp.transpose(0, 2, 3, 1)                              # (N, H+2, W+2, C_in)
    xs = xp.reshape(N, Hs, 2, Ws, 2, C_in)
    xs = xs.transpose(0, 1, 3, 2, 4, 5).reshape(N, Hs, Ws, K4)

    # Per-tap weights: W2[2*di+dj, (2a+b)*C_in + c, co] = W[co, c, 2*di+a, 2*dj+b]
    w2 = conv_w.reshape(C_out, C_in, 2, 2, 2, 2)
    w2 = w2.transpose(2, 4, 3, 5, 1, 0).reshape(4, K4, C_out)
    w2 = jnp.pad(w2.astype(jnp.bfloat16), ((0, 0), (0, 0), (0, C_pad - C_out)))

    gamma = jnp.pad(bn_gamma.astype(jnp.float32), (0, C_pad - C_out))
    beta = jnp.pad(bn_beta.astype(jnp.float32), (0, C_pad - C_out))

    # ---- Phase 1: per-sample implicit-GEMM conv + partial BN stats ----
    # Grid over batch: N (>=2) fat steps -> both v7x TensorCores busy.
    cost = pl.CostEstimate(
        flops=2 * N * Ho * Wo * 4 * K4 * C_pad,
        transcendentals=0,
        bytes_accessed=(xs.size * 2 + w2.size * 2
                        + N * Ho * Wo * C_pad * 2 + N * 2 * C_pad * 4))
    y, stats = pl.pallas_call(
        _conv_stats_kernel,
        grid=(N,),
        in_specs=[
            pl.BlockSpec((1, Hs, Ws, K4), lambda n: (n, 0, 0, 0)),
            pl.BlockSpec((4, K4, C_pad), lambda n: (0, 0, 0)),
        ],
        out_specs=[
            pl.BlockSpec((1, Ho * Wo, C_pad), lambda n: (n, 0, 0)),
            pl.BlockSpec((1, 2, C_pad), lambda n: (n, 0, 0)),
        ],
        out_shape=[
            jax.ShapeDtypeStruct((N, Ho * Wo, C_pad), jnp.bfloat16),
            jax.ShapeDtypeStruct((N, 2, C_pad), jnp.float32),
        ],
        scratch_shapes=[pltpu.VMEM((Ho * Wo, C_pad), jnp.float32)],
        compiler_params=pltpu.CompilerParams(
            dimension_semantics=("parallel",),
            vmem_limit_bytes=_VMEM_LIMIT),
        cost_estimate=cost,
    )(xs, w2)

    # ---- BN statistics -> per-channel scale/shift (tiny, plain JAX) ----
    total_sum = jnp.sum(stats[:, 0, :], axis=0)                  # (C_pad,)
    total_sumsq = jnp.sum(stats[:, 1, :], axis=0)                # (C_pad,)
    mean = total_sum / M
    var = jnp.maximum(total_sumsq / M - mean * mean, 0.0)        # biased variance
    scale = gamma * lax.rsqrt(var + _EPS)
    shift = beta - mean * scale

    # ---- Phase 2: fused normalize + affine + LeakyReLU, in place on y ----
    out_bf16 = pl.pallas_call(
        _bn_lrelu_kernel,
        grid=(N,),
        in_specs=[
            pl.BlockSpec((1, Ho * Wo, C_pad), lambda n: (n, 0, 0)),
            pl.BlockSpec((1, 1, C_pad), lambda n: (0, 0, 0)),
            pl.BlockSpec((1, 1, C_pad), lambda n: (0, 0, 0)),
        ],
        out_specs=pl.BlockSpec((1, Ho * Wo, C_pad), lambda n: (n, 0, 0)),
        out_shape=jax.ShapeDtypeStruct((N, Ho * Wo, C_pad), jnp.bfloat16),
        input_output_aliases={0: 0},          # reuse the y buffer, no new alloc
        compiler_params=pltpu.CompilerParams(
            dimension_semantics=("parallel",),
            vmem_limit_bytes=_VMEM_LIMIT),
    )(y, scale.reshape(1, 1, C_pad), shift.reshape(1, 1, C_pad))

    # Slice lane padding, restore NCHW for API parity with the PyTorch module.
    # Transpose runs on bf16 data (half the HBM traffic), cast to f32 last.
    out = out_bf16[:, :, :C_out].reshape(N, Ho, Wo, C_out)
    return out.transpose(0, 3, 1, 2).astype(jnp.float32)


def _reference(x, conv_w, conv_b, bn_gamma, bn_beta):
    y = lax.conv_general_dilated(
        x, conv_w, window_strides=(2, 2), padding=((1, 1), (1, 1)),
        dimension_numbers=("NCHW", "OIHW", "NCHW"))
    y = y + conv_b[None, :, None, None]
    mean = jnp.mean(y, axis=(0, 2, 3), keepdims=True)
    var = jnp.mean((y - mean) ** 2, axis=(0, 2, 3), keepdims=True)
    y = (y - mean) * lax.rsqrt(var + _EPS)
    y = y * bn_gamma[None, :, None, None] + bn_beta[None, :, None, None]
    return jnp.where(y > 0, y, _LRELU_SLOPE * y)


if __name__ == "__main__":
    key = jax.random.PRNGKey(0)
    k_x, k_w, k_b = jax.random.split(key, 3)

    N, C_in, H, W = 2, 4, 16, 16
    C_out = 8

    x = jax.random.normal(k_x, (N, C_in, H, W), dtype=jnp.float32)

    # Shapes match nn.Conv2d(4, 8, 4, stride=2, padding=1) + BatchNorm2d(8).
    conv_w = 0.02 * jax.random.normal(k_w, (C_out, C_in, 4, 4), dtype=jnp.float32)
    conv_b = 0.01 * jax.random.normal(k_b, (C_out,), dtype=jnp.float32)
    bn_gamma = jnp.ones((C_out,), dtype=jnp.float32)
    bn_beta = jnp.zeros((C_out,), dtype=jnp.float32)

    fwd = jax.jit(discriminator_block_forward)
    out = jax.block_until_ready(fwd(x, conv_w, conv_b, bn_gamma, bn_beta))

    ref = _reference(x, conv_w, conv_b, bn_gamma, bn_beta)
    assert out.shape == (N, C_out, H // 2, W // 2), out.shape
    # bf16 GEMM inputs and bf16 intermediate -> relaxed tolerance vs f32 reference.
    err = float(jnp.max(jnp.abs(out - ref)))
    assert jnp.allclose(out, ref, atol=5e-2, rtol=5e-2), f"max abs err {err}"

    print("KERNEL_OK")
</pallas_src>

<mosaic_0001>
module attributes {stable_mosaic.version = 11 : i64} {
  func.func @_conv_stats_kernel(%arg0: i32, %arg1: memref<1x9x9x16xbf16, #tpu.memory_space<vmem>>, %arg2: memref<4x16x128xbf16, #tpu.memory_space<vmem>>, %arg3: memref<1x64x128xbf16, #tpu.memory_space<vmem>>, %arg4: memref<1x2x128xf32, #tpu.memory_space<vmem>>, %arg5: memref<64x128xf32, #tpu.memory_space<vmem>>) attributes {dimension_semantics = [#tpu.dimension_semantics<parallel>], iteration_bounds = array<i64: 2>, scalar_prefetch = 0 : i64, scratch_operands = 1 : i64, tpu.core_type = #tpu.core_type<tc>, window_params = [{transform_indices = @transform_0, window_bounds = array<i64: 1, 9, 9, 16>}, {pipeline_mode = #tpu.pipeline_mode<synchronous>, transform_indices = @transform_1, window_bounds = array<i64: 4, 16, 128>}, {transform_indices = @transform_2, window_bounds = array<i64: 1, 64, 128>}, {transform_indices = @transform_3, window_bounds = array<i64: 1, 2, 128>}]} {
    %cst = arith.constant 0.000000e+00 : f32
    %0 = vector.broadcast %cst : f32 to vector<64x128xf32>
    %c0 = arith.constant 0 : index
    %c0_0 = arith.constant 0 : index
    %1 = vector.load %arg5[%c0, %c0_0] : memref<64x128xf32, #tpu.memory_space<vmem>>, vector<64x128xf32>
    tpu.vector_store %arg5[%c0, %c0_0], %0 {strides = array<i32>} : memref<64x128xf32, #tpu.memory_space<vmem>>, vector<64x128xf32>,
    %c0_1 = arith.constant 0 : index
    %c0_2 = arith.constant 0 : index
    %c0_3 = arith.constant 0 : index
    %c0_4 = arith.constant 0 : index
    %2 = vector.load %arg1[%c0_1, %c0_2, %c0_3, %c0_4] : memref<1x9x9x16xbf16, #tpu.memory_space<vmem>>, vector<1x8x8x16xbf16>
    %3 = vector.shape_cast %2 : vector<1x8x8x16xbf16> to vector<8x8x16xbf16>
    %4 = vector.shape_cast %3 : vector<8x8x16xbf16> to vector<64x16xbf16>
    %c0_5 = arith.constant 0 : index
    %c0_6 = arith.constant 0 : index
    %5 = vector.load %arg5[%c0_5, %c0_6] : memref<64x128xf32, #tpu.memory_space<vmem>>, vector<64x128xf32>
    %c0_7 = arith.constant 0 : index
    %c0_8 = arith.constant 0 : index
    %c0_9 = arith.constant 0 : index
    %6 = vector.load %arg2[%c0_7, %c0_8, %c0_9] : memref<4x16x128xbf16, #tpu.memory_space<vmem>>, vector<1x16x128xbf16>
    %7 = vector.shape_cast %6 : vector<1x16x128xbf16> to vector<16x128xbf16>
    %cst_10 = arith.constant dense<0.000000e+00> : vector<64x128xf32>
    %8 = tpu.matmul %4, %7, %cst_10 {dimension_numbers = #tpu.dot_dimension_numbers<[1], [0], [0], [1], [0, 0, 1, 1], [], []>} : vector<64x16xbf16>, vector<16x128xbf16>, vector<64x128xf32> -> vector<64x128xf32>
    %9 = arith.addf %5, %8 : vector<64x128xf32>
    %c0_11 = arith.constant 0 : index
    %c0_12 = arith.constant 0 : index
    %10 = vector.load %arg5[%c0_11, %c0_12] : memref<64x128xf32, #tpu.memory_space<vmem>>, vector<64x128xf32>
    tpu.vector_store %arg5[%c0_11, %c0_12], %9 {strides = array<i32>} : memref<64x128xf32, #tpu.memory_space<vmem>>, vector<64x128xf32>,
    %c0_13 = arith.constant 0 : index
    %c0_14 = arith.constant 0 : index
    %c1 = arith.constant 1 : index
    %c0_15 = arith.constant 0 : index
    %11 = vector.load %arg1[%c0_13, %c0_14, %c1, %c0_15] : memref<1x9x9x16xbf16, #tpu.memory_space<vmem>>, vector<1x8x8x16xbf16>
    %12 = vector.shape_cast %11 : vector<1x8x8x16xbf16> to vector<8x8x16xbf16>
    %13 = vector.shape_cast %12 : vector<8x8x16xbf16> to vector<64x16xbf16>
    %c0_16 = arith.constant 0 : index
    %c0_17 = arith.constant 0 : index
    %14 = vector.load %arg5[%c0_16, %c0_17] : memref<64x128xf32, #tpu.memory_space<vmem>>, vector<64x128xf32>
    %c1_18 = arith.constant 1 : index
    %c0_19 = arith.constant 0 : index
    %c0_20 = arith.constant 0 : index
    %15 = vector.load %arg2[%c1_18, %c0_19, %c0_20] : memref<4x16x128xbf16, #tpu.memory_space<vmem>>, vector<1x16x128xbf16>
    %16 = vector.shape_cast %15 : vector<1x16x128xbf16> to vector<16x128xbf16>
    %cst_21 = arith.constant dense<0.000000e+00> : vector<64x128xf32>
    %17 = tpu.matmul %13, %16, %cst_21 {dimension_numbers = #tpu.dot_dimension_numbers<[1], [0], [0], [1], [0, 0, 1, 1], [], []>} : vector<64x16xbf16>, vector<16x128xbf16>, vector<64x128xf32> -> vector<64x128xf32>
    %18 = arith.addf %14, %17 : vector<64x128xf32>
    %c0_22 = arith.constant 0 : index
    %c0_23 = arith.constant 0 : index
    %19 = vector.load %arg5[%c0_22, %c0_23] : memref<64x128xf32, #tpu.memory_space<vmem>>, vector<64x128xf32>
    tpu.vector_store %arg5[%c0_22, %c0_23], %18 {strides = array<i32>} : memref<64x128xf32, #tpu.memory_space<vmem>>, vector<64x128xf32>,
    %c0_24 = arith.constant 0 : index
    %c1_25 = arith.constant 1 : index
    %c0_26 = arith.constant 0 : index
    %c0_27 = arith.constant 0 : index
    %20 = vector.load %arg1[%c0_24, %c1_25, %c0_26, %c0_27] : memref<1x9x9x16xbf16, #tpu.memory_space<vmem>>, vector<1x8x8x16xbf16>
    %21 = vector.shape_cast %20 : vector<1x8x8x16xbf16> to vector<8x8x16xbf16>
    %22 = vector.shape_cast %21 : vector<8x8x16xbf16> to vector<64x16xbf16>
    %c0_28 = arith.constant 0 : index
    %c0_29 = arith.constant 0 : index
    %23 = vector.load %arg5[%c0_28, %c0_29] : memref<64x128xf32, #tpu.memory_space<vmem>>, vector<64x128xf32>
    %c2 = arith.constant 2 : index
    %c0_30 = arith.constant 0 : index
    %c0_31 = arith.constant 0 : index
    %24 = vector.load %arg2[%c2, %c0_30, %c0_31] : memref<4x16x128xbf16, #tpu.memory_space<vmem>>, vector<1x16x128xbf16>
    %25 = vector.shape_cast %24 : vector<1x16x128xbf16> to vector<16x128xbf16>
    %cst_32 = arith.constant dense<0.000000e+00> : vector<64x128xf32>
    %26 = tpu.matmul %22, %25, %cst_32 {dimension_numbers = #tpu.dot_dimension_numbers<[1], [0], [0], [1], [0, 0, 1, 1], [], []>} : vector<64x16xbf16>, vector<16x128xbf16>, vector<64x128xf32> -> vector<64x128xf32>
    %27 = arith.addf %23, %26 : vector<64x128xf32>
    %c0_33 = arith.constant 0 : index
    %c0_34 = arith.constant 0 : index
    %28 = vector.load %arg5[%c0_33, %c0_34] : memref<64x128xf32, #tpu.memory_space<vmem>>, vector<64x128xf32>
    tpu.vector_store %arg5[%c0_33, %c0_34], %27 {strides = array<i32>} : memref<64x128xf32, #tpu.memory_space<vmem>>, vector<64x128xf32>,
    %c0_35 = arith.constant 0 : index
    %c1_36 = arith.constant 1 : index
    %c1_37 = arith.constant 1 : index
    %c0_38 = arith.constant 0 : index
    %29 = vector.load %arg1[%c0_35, %c1_36, %c1_37, %c0_38] : memref<1x9x9x16xbf16, #tpu.memory_space<vmem>>, vector<1x8x8x16xbf16>
    %30 = vector.shape_cast %29 : vector<1x8x8x16xbf16> to vector<8x8x16xbf16>
    %31 = vector.shape_cast %30 : vector<8x8x16xbf16> to vector<64x16xbf16>
    %c0_39 = arith.constant 0 : index
    %c0_40 = arith.constant 0 : index
    %32 = vector.load %arg5[%c0_39, %c0_40] : memref<64x128xf32, #tpu.memory_space<vmem>>, vector<64x128xf32>
    %c3 = arith.constant 3 : index
    %c0_41 = arith.constant 0 : index
    %c0_42 = arith.constant 0 : index
    %33 = vector.load %arg2[%c3, %c0_41, %c0_42] : memref<4x16x128xbf16, #tpu.memory_space<vmem>>, vector<1x16x128xbf16>
    %34 = vector.shape_cast %33 : vector<1x16x128xbf16> to vector<16x128xbf16>
    %cst_43 = arith.constant dense<0.000000e+00> : vector<64x128xf32>
    %35 = tpu.matmul %31, %34, %cst_43 {dimension_numbers = #tpu.dot_dimension_numbers<[1], [0], [0], [1], [0, 0, 1, 1], [], []>} : vector<64x16xbf16>, vector<16x128xbf16>, vector<64x128xf32> -> vector<64x128xf32>
    %36 = arith.addf %32, %35 : vector<64x128xf32>
    %c0_44 = arith.constant 0 : index
    %c0_45 = arith.constant 0 : index
    %37 = vector.load %arg5[%c0_44, %c0_45] : memref<64x128xf32, #tpu.memory_space<vmem>>, vector<64x128xf32>
    tpu.vector_store %arg5[%c0_44, %c0_45], %36 {strides = array<i32>} : memref<64x128xf32, #tpu.memory_space<vmem>>, vector<64x128xf32>,
    %c0_46 = arith.constant 0 : index
    %c0_47 = arith.constant 0 : index
    %38 = vector.load %arg5[%c0_46, %c0_47] : memref<64x128xf32, #tpu.memory_space<vmem>>, vector<64x128xf32>
    %39 = arith.truncf %38 : vector<64x128xf32> to vector<64x128xbf16>
    %c0_48 = arith.constant 0 : index
    %c0_49 = arith.constant 0 : index
    %c0_50 = arith.constant 0 : index
    %40 = vector.load %arg3[%c0_48, %c0_49, %c0_50] : memref<1x64x128xbf16, #tpu.memory_space<vmem>>, vector<1x64x128xbf16>
    %41 = vector.shape_cast %40 : vector<1x64x128xbf16> to vector<64x128xbf16>
    %42 = vector.shape_cast %39 : vector<64x128xbf16> to vector<1x64x128xbf16>
    tpu.vector_store %arg3[%c0_48, %c0_49, %c0_50], %42 {strides = array<i32>} : memref<1x64x128xbf16, #tpu.memory_space<vmem>>, vector<1x64x128xbf16>,
    %cst_51 = arith.constant dense<0.000000e+00> : vector<128xf32>
    %43 = vector.multi_reduction <add>, %38, %cst_51 [0] : vector<64x128xf32> to vector<128xf32>
    %44 = vector.shape_cast %43 : vector<128xf32> to vector<1x128xf32>
    %45 = arith.mulf %38, %38 : vector<64x128xf32>
    %cst_52 = arith.constant dense<0.000000e+00> : vector<128xf32>
    %46 = vector.multi_reduction <add>, %45, %cst_52 [0] : vector<64x128xf32> to vector<128xf32>
    %47 = vector.shape_cast %46 : vector<128xf32> to vector<1x128xf32>
    %48 = tpu.concatenate %44, %47 in 0 : vector<1x128xf32>, vector<1x128xf32> -> vector<2x128xf32>
    %c0_53 = arith.constant 0 : index
    %c0_54 = arith.constant 0 : index
    %c0_55 = arith.constant 0 : index
    %49 = vector.load %arg4[%c0_53, %c0_54, %c0_55] : memref<1x2x128xf32, #tpu.memory_space<vmem>>, vector<1x2x128xf32>
    %50 = vector.shape_cast %49 : vector<1x2x128xf32> to vector<2x128xf32>
    %51 = vector.shape_cast %48 : vector<2x128xf32> to vector<1x2x128xf32>
    tpu.vector_store %arg4[%c0_53, %c0_54, %c0_55], %51 {strides = array<i32>} : memref<1x2x128xf32, #tpu.memory_space<vmem>>, vector<1x2x128xf32>,
    return
  }
  func.func @transform_0(%arg0: i32) -> (i32, i32, i32, i32) {
    %c0_i32 = arith.constant 0 : i32
    %c0_i32_0 = arith.constant 0 : i32
    %c0_i32_1 = arith.constant 0 : i32
    %c0_i32_2 = arith.constant 0 : i32
    return %arg0, %c0_i32, %c0_i32_0, %c0_i32_1 : i32, i32, i32, i32
  }
  func.func @transform_1(%arg0: i32) -> (i32, i32, i32) {
    %c0_i32 = arith.constant 0 : i32
    %c0_i32_0 = arith.constant 0 : i32
    %c0_i32_1 = arith.constant 0 : i32
    %c0_i32_2 = arith.constant 0 : i32
    return %c0_i32, %c0_i32_0, %c0_i32_1 : i32, i32, i32
  }
  func.func @transform_2(%arg0: i32) -> (i32, i32, i32) {
    %c0_i32 = arith.constant 0 : i32
    %c0_i32_0 = arith.constant 0 : i32
    %c0_i32_1 = arith.constant 0 : i32
    return %arg0, %c0_i32, %c0_i32_0 : i32, i32, i32
  }
  func.func @transform_3(%arg0: i32) -> (i32, i32, i32) {
    %c0_i32 = arith.constant 0 : i32
    %c0_i32_0 = arith.constant 0 : i32
    %c0_i32_1 = arith.constant 0 : i32
    return %arg0, %c0_i32, %c0_i32_0 : i32, i32, i32
  }
}

module attributes {stable_mosaic.version = 11 : i64} {
  func.func @_bn_lrelu_kernel(%arg0: i32, %arg1: memref<1x64x128xbf16, #tpu.memory_space<vmem>>, %arg2: memref<1x1x128xf32, #tpu.memory_space<vmem>>, %arg3: memref<1x1x128xf32, #tpu.memory_space<vmem>>, %arg4: memref<1x64x128xbf16, #tpu.memory_space<vmem>>) attributes {dimension_semantics = [#tpu.dimension_semantics<parallel>], iteration_bounds = array<i64: 2>, scalar_prefetch = 0 : i64, scratch_operands = 0 : i64, tpu.core_type = #tpu.core_type<tc>, window_params = [{transform_indices = @transform_0, window_bounds = array<i64: 1, 64, 128>}, {pipeline_mode = #tpu.pipeline_mode<synchronous>, transform_indices = @transform_1, window_bounds = array<i64: 1, 1, 128>}, {pipeline_mode = #tpu.pipeline_mode<synchronous>, transform_indices = @transform_2, window_bounds = array<i64: 1, 1, 128>}, {transform_indices = @transform_3, window_bounds = array<i64: 1, 64, 128>}]} {
    %c0 = arith.constant 0 : index
    %c0_0 = arith.constant 0 : index
    %c0_1 = arith.constant 0 : index
    %0 = vector.load %arg1[%c0, %c0_0, %c0_1] : memref<1x64x128xbf16, #tpu.memory_space<vmem>>, vector<1x64x128xbf16>
    %1 = arith.extf %0 : vector<1x64x128xbf16> to vector<1x64x128xf32>
    %c0_2 = arith.constant 0 : index
    %c0_3 = arith.constant 0 : index
    %c0_4 = arith.constant 0 : index
    %2 = vector.load %arg2[%c0_2, %c0_3, %c0_4] : memref<1x1x128xf32, #tpu.memory_space<vmem>>, vector<1x1x128xf32>
    %3 = vector.broadcast %2 : vector<1x1x128xf32> to vector<1x64x128xf32>
    %4 = arith.mulf %1, %3 : vector<1x64x128xf32>
    %c0_5 = arith.constant 0 : index
    %c0_6 = arith.constant 0 : index
    %c0_7 = arith.constant 0 : index
    %5 = vector.load %arg3[%c0_5, %c0_6, %c0_7] : memref<1x1x128xf32, #tpu.memory_space<vmem>>, vector<1x1x128xf32>
    %6 = vector.broadcast %5 : vector<1x1x128xf32> to vector<1x64x128xf32>
    %7 = arith.addf %4, %6 : vector<1x64x128xf32>
    %cst = arith.constant 0.000000e+00 : f32
    %8 = vector.broadcast %cst : f32 to vector<1x64x128xf32>
    %9 = arith.cmpf ogt, %7, %8 : vector<1x64x128xf32>
    %cst_8 = arith.constant 2.000000e-01 : f32
    %10 = vector.broadcast %cst_8 : f32 to vector<1x64x128xf32>
    %11 = arith.mulf %10, %7 : vector<1x64x128xf32>
    %12 = arith.select %9, %7, %11 : vector<1x64x128xi1>, vector<1x64x128xf32>
    %13 = arith.truncf %12 : vector<1x64x128xf32> to vector<1x64x128xbf16>
    %c0_9 = arith.constant 0 : index
    %c0_10 = arith.constant 0 : index
    %c0_11 = arith.constant 0 : index
    %14 = vector.load %arg4[%c0_9, %c0_10, %c0_11] : memref<1x64x128xbf16, #tpu.memory_space<vmem>>, vector<1x64x128xbf16>
    tpu.vector_store %arg4[%c0_9, %c0_10, %c0_11], %13 {strides = array<i32>} : memref<1x64x128xbf16, #tpu.memory_space<vmem>>, vector<1x64x128xbf16>,
    return
  }
  func.func @transform_0(%arg0: i32) -> (i32, i32, i32) {
    %c0_i32 = arith.constant 0 : i32
    %c0_i32_0 = arith.constant 0 : i32
    %c0_i32_1 = arith.constant 0 : i32
    return %arg0, %c0_i32, %c0_i32_0 : i32, i32, i32
  }
  func.func @transform_1(%arg0: i32) -> (i32, i32, i32) {
    %c0_i32 = arith.constant 0 : i32
    %c0_i32_0 = arith.constant 0 : i32
    %c0_i32_1 = arith.constant 0 : i32
    %c0_i32_2 = arith.constant 0 : i32
    return %c0_i32, %c0_i32_0, %c0_i32_1 : i32, i32, i32
  }
  func.func @transform_2(%arg0: i32) -> (i32, i32, i32) {
    %c0_i32 = arith.constant 0 : i32
    %c0_i32_0 = arith.constant 0 : i32
    %c0_i32_1 = arith.constant 0 : i32
    %c0_i32_2 = arith.constant 0 : i32
    return %c0_i32, %c0_i32_0, %c0_i32_1 : i32, i32, i32
  }
  func.func @transform_3(%arg0: i32) -> (i32, i32, i32) {
    %c0_i32 = arith.constant 0 : i32
    %c0_i32_0 = arith.constant 0 : i32
    %c0_i32_1 = arith.constant 0 : i32
    return %arg0, %c0_i32, %c0_i32_0 : i32, i32, i32
  }
}

</mosaic_0001>

<bundles_post_ra>
// kernel: discriminator_block_forward.3
= control target key start
LH: loop header
LB: loop body
LE: loop exit
PB: predicated region body
PF: predicated region fallthrough
CT: control target
= control target key end

     0   :  { %s399_s12 = smov 0   ;;  %s429_s0 = inlined_call_operand.vmem [shape: bf16[2,64,128], index: 0, kind: input, shape index: {}, may-alias: {0,3}]   ;;  %s430_s1 = inlined_call_operand.vmem [shape: f32[1,1,128], index: 1, kind: input, shape index: {}]   ;;  %s431_s2 = inlined_call_operand.vmem [shape: f32[1,1,128], index: 2, kind: input, shape index: {}]   ;;  %s432_s3 = inlined_call_operand.vmem [shape: bf16[2,64,128], index: 3, kind: output, shape index: {}, may-alias: {0,3}]  }
   0x1 LB: > { %s306_s13 = sadd.s32 4294967295, %s377_s12   ;;  %p310_p0 = scmp.ge.s32.totalorder %s377_s12, 1  ;;  %s377_s12 = sphi %s399_s12, %s13_s12  }
   0x2   : > { %p137_p1 = scmp.lt.s32.totalorder %s377_s12, 3 }
   0x4   : > { %p138_p2 = pnand %p310_p0, %p137_p1 }
   0x5   : > { %p161_p3 = scmp.lt.s32.totalorder (!%p138_p2), %s306_s13, 1 }
   0x6   : > { %141 = sbr.rel (%p138_p2) target bundleno = 32 (0x20), region = 32 }
   0xb   : > { %s434_s13 = smov (!%p161_p3, %s306_s13), 1  ;;  %v369_v0 = vld [vmem:[%s430_s1] ss:$0 sm:$0xff] }
   0xc   : > { %s317_s14 = sshll.u32 %s434_s13, 5  ;;  %v370_v9 = vld [vmem:[%s431_s2] ss:$0 sm:$0xff] }
   0xd   : > { %s165_s17 = scalar_lea.vmem %s429_s0, %s317_s14  ;;  %s170_s24 = scalar_lea.vmem %s432_s3, %s317_s14 }
   0xe   : > { %v320_v1 = vld [vmem:[%s165_s17] sm:$0xff]   ;;  %v355_v2 = vld [vmem:[%s165_s17 + $0x8] sm:$0xff]   ;;  %v356_v3 = vld [vmem:[%s165_s17 + $0x10] sm:$0xff]  }
   0xf   : > { %v321_v4 = vunpack.c.l.bf16 %v320_v1  ;;  %v322_v5 = vunpack.c.h.bf16 %v320_v1  ;;  %v325_v6 = vunpack.c.l.bf16 %v355_v2  ;;  %v326_v7 = vunpack.c.h.bf16 %v355_v2  ;;  %v357_v8 = vld [vmem:[%s165_s17 + $0x18] sm:$0xff]  }
  0x10   : > { %v329_v10 = vunpack.c.l.bf16 %v356_v3  ;;  %v330_v11 = vunpack.c.h.bf16 %v356_v3  ;;  %v333_v12 = vunpack.c.l.bf16 %v357_v8  ;;  %v334_v13 = vunpack.c.h.bf16 %v357_v8 }
  0x11   : > { %v191_v14 = vmul.f32 %v369_v0, %v321_v4  ;;  %v192_v15 = vmul.f32 %v369_v0, %v322_v5  ;;  %v193_v16 = vmul.f32 %v369_v0, %v325_v6  ;;  %v194_v17 = vmul.f32 %v369_v0, %v326_v7 }
  0x12   : > { %v195_v18 = vmul.f32 %v369_v0, %v329_v10  ;;  %v196_v19 = vmul.f32 %v369_v0, %v330_v11  ;;  %v197_v20 = vmul.f32 %v369_v0, %v333_v12  ;;  %v198_v21 = vmul.f32 %v369_v0, %v334_v13 }
  0x13   : > { %v203_v22 = vadd.f32 %v370_v9, %v191_v14  ;;  %v204_v23 = vadd.f32 %v370_v9, %v192_v15  ;;  %v205_v24 = vadd.f32 %v370_v9, %v193_v16  ;;  %v206_v25 = vadd.f32 %v370_v9, %v194_v17 }
  0x14   : > { %v207_v26 = vadd.f32 %v370_v9, %v195_v18  ;;  %v208_v27 = vadd.f32 %v370_v9, %v196_v19  ;;  %v209_v28 = vadd.f32 %v370_v9, %v197_v20  ;;  %v210_v29 = vadd.f32 %v370_v9, %v198_v21 }
  0x15   : > { %vm211_vm0 = vcmp.gt.f32.partialorder %v203_v22, 0.0  ;;  %vm212_vm1 = vcmp.gt.f32.partialorder %v204_v23, 0.0  ;;  %v219_v30 = vmul.f32 0.2, %v203_v22  ;;  %v220_v31 = vmul.f32 0.2, %v204_v23 }
  0x16   : > { %vm213_vm2 = vcmp.gt.f32.partialorder %v205_v24, 0.0  ;;  %vm214_vm3 = vcmp.gt.f32.partialorder %v206_v25, 0.0  ;;  %v221_v32 = vmul.f32 0.2, %v205_v24  ;;  %v222_v33 = vmul.f32 0.2, %v206_v25 }
  0x17   : > { %v227_v34 = vsel %vm211_vm0, %v203_v22, %v219_v30  ;;  %v228_v35 = vsel %vm212_vm1, %v204_v23, %v220_v31  ;;  %vm215_vm4 = vcmp.gt.f32.partialorder %v207_v26, 0.0  ;;  %vm216_vm5 = vcmp.gt.f32.partialorder %v208_v27, 0.0 }
  0x18   : > { %v338_v36 = vpack.c.bf16 %v228_v35, %v227_v34  ;;  %v229_v37 = vsel %vm213_vm2, %v205_v24, %v221_v32  ;;  %v230_v38 = vsel %vm214_vm3, %v206_v25, %v222_v33  ;;  %v223_v39 = vmul.f32 0.2, %v207_v26 }
  0x19   : > { %v343_v40 = vpack.c.bf16 %v230_v38, %v229_v37  ;;  %v224_v41 = vmul.f32 0.2, %v208_v27  ;;  %vm217_vm6 = vcmp.gt.f32.partialorder %v209_v28, 0.0  ;;  %vm218_vm7 = vcmp.gt.f32.partialorder %v210_v29, 0.0 }
  0x1a   : > { %339 = vst [vmem:[%s170_s24] sm:$0xff] %v338_v36   ;;  %v231_v42 = vsel %vm215_vm4, %v207_v26, %v223_v39  ;;  %v225_v43 = vmul.f32 0.2, %v209_v28  ;;  %v226_v44 = vmul.f32 0.2, %v210_v29 }
  0x1b   : > { %358 = vst [vmem:[%s170_s24 + $0x8] sm:$0xff] %v343_v40   ;;  %v232_v45 = vsel %vm216_vm5, %v208_v27, %v224_v41 }
  0x1c   : > { %v348_v46 = vpack.c.bf16 %v232_v45, %v231_v42  ;;  %v233_v47 = vsel %vm217_vm6, %v209_v28, %v225_v43  ;;  %v234_v48 = vsel %vm218_vm7, %v210_v29, %v226_v44 }
  0x1d   : > { %v353_v49 = vpack.c.bf16 %v234_v48, %v233_v47 }
  0x1e   : > { %359 = vst [vmem:[%s170_s24 + $0x10] sm:$0xff] %v348_v46  }
  0x1f   : > { %360 = vst [vmem:[%s170_s24 + $0x18] sm:$0xff] %v353_v49  }
  0x20 PF: > { %s13_s12 = sadd.s32 1, %s377_s12  }
  0x21   : > { %p10_p4 = scmp.ge.s32.totalorder %s13_s12, 4  }
  0x23   :  { %12 = sbr.rel (!%p10_p4) target bundleno = 1 (0x1), region = 62 }

// kernel: discriminator_block_forward.2
= control target key start
LH: loop header
LB: loop body
LE: loop exit
PB: predicated region body
PF: predicated region fallthrough
CT: control target
= control target key end

     0   :  { %s1152_s12 = smov 0   ;;  %s1302_s0 = inlined_call_operand.vmem [shape: bf16[2,9,9,16], index: 0, kind: input, shape index: {}]   ;;  %s1303_s1 = inlined_call_operand.vmem [shape: bf16[4,16,128], index: 1, kind: input, shape index: {}]   ;;  %s1304_s2 = inlined_call_operand.vmem [shape: bf16[2,64,128], index: 2, kind: output, shape index: {0}]   ;;  %s1305_s3 = inlined_call_operand.vmem [shape: f32[2,2,128], index: 3, kind: output, shape index: {1}]  }
   0x1 LB: > { %s974_s13 = sadd.s32 4294967295, %s1130_s12   ;;  %p978_p0 = scmp.ge.s32.totalorder %s1130_s12, 1  ;;  %s1130_s12 = sphi %s1152_s12, %s14_s12  }
   0x2   : > { %p140_p1 = scmp.lt.s32.totalorder %s1130_s12, 3 }
   0x4   : > { %p141_p2 = pnand %p978_p0, %p140_p1 }
   0x5   : > { %p168_p3 = scmp.lt.s32.totalorder (!%p141_p2), %s974_s13, 1 }
   0x6   : > { %144 = sbr.rel (%p141_p2) target bundleno = 243 (0xf3), region = 28 }
   0xb   : > { %v1090_v0 = vld [vmem:[%s1303_s1 + $0x10] sm:$0xff]  ;;  %v1084_v1 = vld [vmem:[%s1303_s1] sm:$0xff]  ;;  %v1085_v2 = vld [vmem:[%s1303_s1 + $0x8] sm:$0xff]  ;;  %s1309_s13 = smov (!%p168_p3, %s974_s13), 1  ;;  %vm235_vm0 = vcmask 130048   ;;  %vm885_vm4 = vcmask 1040384  }
   0xc   : > { %v1091_v3 = vld [vmem:[%s1303_s1 + $0x18] sm:$0xff]  ;;  %575 = vmatpush.bf16.msra.mxu2 %v1090_v0  ;;  %255 = vmatpush.bf16.msra.mxu0 %v1084_v1  ;;  %s1115_s22 = smul.u32 72, %s1309_s13  ;;  %vm309_vm1 = vsmask.f32 3328  ;;  %vm310_vm2 = vsmask.f32 7440 }
   0xd   : > { %472 = vmatpush.bf16.msra.mxu1 %v1085_v2  ;;  %789 = vmatpush.bf16.msra.mxu3 %v1091_v3  ;;  %vm1199_vm3 = vmor %vm309_vm1, %vm310_vm2  ;;  %s1079_s26 = sshll.u32 %s1309_s13, 5  ;;  %s982_s30 = sshll.u32 %s1309_s13, 1 }
   0xe   : > { %s1178_s25 = scalar_lea.vmem %s1302_s0, %s1115_s22  ;;  %s1289_s29 = scalar_lea.vmem %s1304_s2, %s1079_s26 }
   0xf   : > { %v1029_v4 = vld [vmem:[%s1178_s25 + $0x8] sm:$0xf]  ;;  %v1086_v5 = vld [vmem:[%s1178_s25 + $0xc] sm:$0xf0]  ;;  %v985_v6 = vld [vmem:[%s1178_s25] sm:$0xf]  ;;  %s181_s6 = scalar_lea.vmem %s1305_s3, %s982_s30 }
  0x10   : > { %v1030_v7 = vor.u32 %v1086_v5, %v1029_v4  ;;  %v1080_v8 = vld [vmem:[%s1178_s25 + $0x4] sm:$0xf0]  ;;  %v293_v9 = vld [vmem:[%s1178_s25] sm:$0xf]  ;;  %v294_v10 = vld [vmem:[%s1178_s25 + $0x4] sm:$0x1] }
  0x11   : > { %v986_v11 = vor.u32 %v1080_v8, %v985_v6  ;;  %v295_v12 = vld [vmem:[%s1178_s25 + $0x8] sm:$0xf]  ;;  %v296_v13 = vld [vmem:[%s1178_s25 + $0xc] sm:$0x1]  ;;  %v313_v14 = vshrl.u32 %v293_v9, 16  ;;  %v316_v15 = vshll.u32 %v293_v9, 16 }
  0x12   : > { %1047 = vmatmul.msk.bf16.vlgmr.msra.gmra.mxu2 %vm235_vm0, %v1030_v7  ;;  %v322_v16 = vshll.u32 %v294_v10, 16  ;;  %v327_v17 = vshrl.u32 %v295_v12, 16  ;;  %v330_v18 = vshll.u32 %v295_v12, 16  ;;  %v336_v19 = vshll.u32 %v296_v13, 16  ;;  %v1051_v20 = vld [vmem:[%s1178_s25 + $0x8] sm:$0xf] }
  0x13   : > { %1003 = vmatmul.msk.bf16.vlgmr.msra.gmra.mxu0 %vm235_vm0, %v986_v11  ;;  %v315_v21 = vrot.slane %v313_v14, 4  ;;  %v318_v22 = vrot.slane %v316_v15, 5  ;;  %v1052_v23 = vld [vmem:[%s1178_s25 + $0xc] sm:$0x1]  ;;  %v1053_v24 = vld [vmem:[%s1178_s25 + $0x10] sm:$0xf] }
  0x14   : > { %v324_v25 = vrot.slane %v322_v16, 5  ;;  %v329_v26 = vrot.slane %v327_v17, 4  ;;  %v332_v27 = vrot.slane %v330_v18, 5  ;;  %v338_v28 = vrot.slane %v336_v19, 5  ;;  %v1054_v29 = vld [vmem:[%s1178_s25 + $0x14] sm:$0x1] }
  0x15   : > { %v319_v30 = vor.u32 %v318_v22, %v315_v21  ;;  %v630_v31 = vshrl.u32 %v1051_v20, 16  ;;  %v633_v32 = vshll.u32 %v1051_v20, 16  ;;  %v639_v33 = vshll.u32 %v1052_v23, 16  ;;  %v1195_v34 = vld [vmem:[%s1178_s25 + $0x18] sm:$0xf] }
  0x16   : > { %v333_v36 = vor.u32 %v332_v27, %v329_v26  ;;  %v644_v37 = vshrl.u32 %v1053_v24, 16  ;;  %v647_v38 = vshll.u32 %v1053_v24, 16  ;;  %v653_v39 = vshll.u32 %v1054_v29, 16  ;;  %v1087_v40 = vld [vmem:[%s1178_s25 + $0x1c] sm:$0xf0] }
  0x17   : > { %v320_v41 = vrot.slane %v319_v30, 4  ;;  %v632_v42 = vrot.slane %v630_v31, 4  ;;  %v635_v43 = vrot.slane %v633_v32, 5  ;;  %v641_v44 = vrot.slane %v639_v33, 5  ;;  %v989_v45 = vld [vmem:[%s1178_s25 + $0x10] sm:$0xf] }
  0x18   : > { %v334_v46 = vrot.slane %v333_v36, 4  ;;  %v646_v47 = vrot.slane %v644_v37, 4  ;;  %v649_v48 = vrot.slane %v647_v38, 5  ;;  %v655_v49 = vrot.slane %v653_v39, 5  ;;  %v1081_v50 = vld [vmem:[%s1178_s25 + $0x14] sm:$0xf0] }
  0x19   : > { %v325_v51 = vsel %vm1199_vm3, %v320_v41, %v324_v25  ;;  %v636_v52 = vor.u32 %v635_v43, %v632_v42  ;;  %v1034_v53 = vor.u32 %v1087_v40, %v1195_v34  ;;  %v990_v54 = vor.u32 %v1081_v50, %v989_v45  ;;  %v297_v55 = vld [vmem:[%s1178_s25 + $0x10] sm:$0xf]  ;;  %v298_v56 = vld [vmem:[%s1178_s25 + $0x14] sm:$0x1]  ;;  %v299_v57 = vld [vmem:[%s1178_s25 + $0x18] sm:$0xf] }
  0x1a   : > { %v339_v58 = vsel %vm1199_vm3, %v334_v46, %v338_v28  ;;  %v435_v59 = vunpack.c.l.b16 %v325_v51  ;;  %v650_v60 = vor.u32 %v649_v48, %v646_v47  ;;  %v341_v61 = vshrl.u32 %v297_v55, 16  ;;  %v300_v0 = vld [vmem:[%s1178_s25 + $0x1c] sm:$0x1]  ;;  %v1055_v7 = vld [vmem:[%s1178_s25 + $0x18] sm:$0xf] }
  0x1b   : > { %v436_v62 = vunpack.c.l.b16 %v339_v58  ;;  %v637_v63 = vrot.slane %v636_v52, 4  ;;  %v344_v1 = vshll.u32 %v297_v55, 16  ;;  %v350_v2 = vshll.u32 %v298_v56, 16  ;;  %v1056_v12 = vld [vmem:[%s1178_s25 + $0x1c] sm:$0x1] }
  0x1c   : > { %v651_v3 = vrot.slane %v650_v60, 4  ;;  %v343_v4 = vrot.slane %v341_v61, 4  ;;  %v355_v5 = vshrl.u32 %v299_v57, 16  ;;  %v358_v6 = vshll.u32 %v299_v57, 16  ;;  %v1057_v13 = vld [vmem:[%s1178_s25 + $0x20] sm:$0xf] }
  0x1d   : > { %v443_v8 = vpack.c.b16 %v436_v62, %v435_v59  ;;  %v642_v9 = vsel %vm1199_vm3, %v637_v63, %v641_v44  ;;  %v346_v10 = vrot.slane %v344_v1, 5  ;;  %v352_v11 = vrot.slane %v350_v2, 5  ;;  %v1058_v23 = vld [vmem:[%s1178_s25 + $0x24] sm:$0x1]  ;;  %v301_v33 = vld [vmem:[%s1178_s25 + $0x20] sm:$0xf] }
  0x1e   : > { %v656_v14 = vsel %vm1199_vm3, %v651_v3, %v655_v49  ;;  %v752_v15 = vunpack.c.l.b16 %v642_v9  ;;  %v357_v16 = vrot.slane %v355_v5, 4  ;;  %v360_v17 = vrot.slane %v358_v6, 5  ;;  %v303_v39 = vld [vmem:[%s1178_s25 + $0x28] sm:$0xf]  ;;  %v1088_v47 = vld [vmem:[%s1178_s25 + $0x2c] sm:$0xf0] }
  0x1f   : > { %1013 = vmatmul.msk.bf16.vlgmr.msra.gmra.mxu1 %vm235_vm0, %v443_v8  ;;  %v753_v18 = vunpack.c.l.b16 %v656_v14  ;;  %v347_v19 = vor.u32 %v346_v10, %v343_v4  ;;  %v364_v20 = vshll.u32 %v300_v0, 16  ;;  %v658_v21 = vshrl.u32 %v1055_v7, 16  ;;  %v1037_v43 = vld [vmem:[%s1178_s25 + $0x28] sm:$0xf]  ;;  %v302_v48 = vld [vmem:[%s1178_s25 + $0x24] sm:$0x1] }
  0x20   : > { %v361_v22 = vor.u32 %v360_v17, %v357_v16  ;;  %v661_v24 = vshll.u32 %v1055_v7, 16  ;;  %v667_v25 = vshll.u32 %v1056_v12, 16  ;;  %v672_v26 = vshrl.u32 %v1057_v13, 16  ;;  %v304_v51 = vld [vmem:[%s1178_s25 + $0x2c] sm:$0x1] }
  0x21   : > { %v760_v27 = vpack.c.b16 %v753_v18, %v752_v15  ;;  %v348_v28 = vrot.slane %v347_v19, 4  ;;  %v366_v29 = vrot.slane %v364_v20, 5  ;;  %v660_v30 = vrot.slane %v658_v21, 4  ;;  %v1059_v58 = vld [vmem:[%s1178_s25 + $0x28] sm:$0xf] }
  0x22   : > { %1048 = vmatmul.msk.bf16.gmra.mxu2 %vm235_vm0, %v1034_v53  ;;  %v362_v31 = vrot.slane %v361_v22, 4  ;;  %v663_v32 = vrot.slane %v661_v24, 5  ;;  %v674_v36 = vrot.slane %v672_v26, 4  ;;  %v675_v37 = vshll.u32 %v1057_v13, 16  ;;  %v1061_v63 = vld [vmem:[%s1178_s25 + $0x30] sm:$0xf] }
  0x23   : > { %1073 = vmatmul.msk.bf16.vlgmr.msra.gmra.mxu3 %vm235_vm0, %v760_v27  ;;  %1004 = vmatmul.msk.bf16.gmra.mxu0 %vm235_vm0, %v990_v54  ;;  %v353_v34 = vsel %vm1199_vm3, %v348_v28, %v352_v11  ;;  %v681_v38 = vshll.u32 %v1058_v23, 16  ;;  %v669_v42 = vrot.slane %v667_v25, 5  ;;  %v369_v49 = vshrl.u32 %v301_v33, 16  ;;  %v1060_v6 = vld [vmem:[%s1178_s25 + $0x2c] sm:$0x1] }
  0x24   : > { %v367_v40 = vsel %vm1199_vm3, %v362_v31, %v366_v29  ;;  %v664_v41 = vor.u32 %v663_v32, %v660_v30  ;;  %v437_v44 = vunpack.c.l.b16 %v353_v34  ;;  %v677_v46 = vrot.slane %v675_v37, 5  ;;  %v993_v11 = vld [vmem:[%s1178_s25 + $0x20] sm:$0xf]  ;;  %v1062_v13 = vld [vmem:[%s1178_s25 + $0x34] sm:$0x1] }
  0x25   : > { %v438_v45 = vunpack.c.l.b16 %v367_v40  ;;  %v372_v52 = vshll.u32 %v301_v33, 16  ;;  %v383_v53 = vshrl.u32 %v303_v39, 16  ;;  %v683_v55 = vrot.slane %v681_v38, 5  ;;  %v1082_v16 = vld [vmem:[%s1178_s25 + $0x24] sm:$0xf0] }
  0x26   : > { %v665_v50 = vrot.slane %v664_v41, 4  ;;  %v678_v54 = vor.u32 %v677_v46, %v674_v36  ;;  %v371_v56 = vrot.slane %v369_v49, 4  ;;  %v386_v57 = vshll.u32 %v303_v39, 16  ;;  %v305_v31 = vld [vmem:[%s1178_s25 + $0x30] sm:$0xf] }
  0x27   : > { %v374_v60 = vrot.slane %v372_v52, 5  ;;  %v378_v61 = vshll.u32 %v302_v48, 16  ;;  %v385_v62 = vrot.slane %v383_v53, 4  ;;  %v444_v0 = vpack.c.b16 %v438_v45, %v437_v44  ;;  %v307_v32 = vld [vmem:[%s1178_s25 + $0x38] sm:$0xf] }
  0x28   : > { %v670_v59 = vsel %vm1199_vm3, %v665_v50, %v669_v42  ;;  %v679_v1 = vrot.slane %v678_v54, 4  ;;  %v1038_v2 = vor.u32 %v1088_v47, %v1037_v43  ;;  %v388_v3 = vrot.slane %v386_v57, 5  ;;  %v1063_v45 = vld [vmem:[%s1178_s25 + $0x38] sm:$0xf]  ;;  %v1065_v46 = vld [vmem:[%s1178_s25 + $0x40] sm:$0xf] }
  0x29   : > { %v375_v4 = vor.u32 %v374_v60, %v371_v56  ;;  %v392_v5 = vshll.u32 %v304_v51, 16  ;;  %v686_v7 = vshrl.u32 %v1059_v58, 16  ;;  %v689_v8 = vshll.u32 %v1059_v58, 16  ;;  %v306_v52 = vld [vmem:[%s1178_s25 + $0x34] sm:$0x1] }
  0x2a   : > { %v684_v9 = vsel %vm1199_vm3, %v679_v1, %v683_v55  ;;  %v754_v10 = vunpack.c.l.b16 %v670_v59  ;;  %v389_v12 = vor.u32 %v388_v3, %v385_v62  ;;  %v700_v14 = vshrl.u32 %v1061_v63, 16  ;;  %v308_v56 = vld [vmem:[%s1178_s25 + $0x3c] sm:$0x1]  ;;  %v997_v3 = vld [vmem:[%s1178_s25 + $0x30] sm:$0xf] }
  0x2b   : > { %v755_v15 = vunpack.c.l.b16 %v684_v9  ;;  %v380_v17 = vrot.slane %v378_v61, 5  ;;  %v688_v18 = vrot.slane %v686_v7, 4  ;;  %v691_v19 = vrot.slane %v689_v8, 5  ;;  %v1064_v8 = vld [vmem:[%s1178_s25 + $0x3c] sm:$0x1] }
  0x2c   : > { %v376_v20 = vrot.slane %v375_v4, 4  ;;  %v695_v21 = vshll.u32 %v1060_v6, 16  ;;  %v702_v22 = vrot.slane %v700_v14, 4  ;;  %v703_v23 = vshll.u32 %v1061_v63, 16  ;;  %v1041_v63 = vld [vmem:[%s1178_s25 + $0x38] sm:$0xf] }
  0x2d   : > { %v390_v24 = vrot.slane %v389_v12, 4  ;;  %v394_v25 = vrot.slane %v392_v5, 5  ;;  %v692_v26 = vor.u32 %v691_v19, %v688_v18  ;;  %v709_v27 = vshll.u32 %v1062_v13, 16  ;;  %v1083_v4 = vld [vmem:[%s1178_s25 + $0x34] sm:$0xf0] }
  0x2e   : > { %v761_v28 = vpack.c.b16 %v755_v15, %v754_v10  ;;  %v994_v29 = vor.u32 %v1082_v16, %v993_v11  ;;  %v705_v30 = vrot.slane %v703_v23, 5  ;;  %v381_v33 = vsel %vm1199_vm3, %v376_v20, %v380_v17  ;;  %v1066_v13 = vld [vmem:[%s1178_s25 + $0x44] sm:$0x1] }
  0x2f   : > { %1014 = vmatmul.msk.bf16.gmra.mxu1 %vm235_vm0, %v444_v0  ;;  %v697_v34 = vrot.slane %v695_v21, 5  ;;  %v395_v37 = vsel %vm1199_vm3, %v390_v24, %v394_v25  ;;  %v693_v38 = vrot.slane %v692_v26, 4  ;;  %v711_v39 = vrot.slane %v709_v27, 5  ;;  %v1089_v0 = vld [vmem:[%s1178_s25 + $0x3c] sm:$0xf0] }
  0x30   : > { %v706_v36 = vor.u32 %v705_v30, %v702_v22  ;;  %v397_v40 = vshrl.u32 %v305_v31, 16  ;;  %v400_v42 = vshll.u32 %v305_v31, 16  ;;  %v411_v43 = vshrl.u32 %v307_v32, 16 }
  0x31   : > { %v414_v44 = vshll.u32 %v307_v32, 16  ;;  %v439_v47 = vunpack.c.l.b16 %v381_v33  ;;  %v440_v48 = vunpack.c.l.b16 %v395_v37  ;;  %v698_v49 = vsel %vm1199_vm3, %v693_v38, %v697_v34 }
  0x32   : > { %1049 = vmatmul.msk.bf16.gmra.mxu2 %vm235_vm0, %v1038_v2  ;;  %v707_v41 = vrot.slane %v706_v36, 4  ;;  %v399_v50 = vrot.slane %v397_v40, 4  ;;  %v402_v53 = vrot.slane %v400_v42, 5  ;;  %v413_v54 = vrot.slane %v411_v43, 4 }
  0x33   : > { %1074 = vmatmul.msk.bf16.gmra.mxu3 %vm235_vm0, %v761_v28  ;;  %1005 = vmatmul.msk.bf16.gmra.mxu0 %vm235_vm0, %v994_v29  ;;  %v416_v55 = vrot.slane %v414_v44, 5  ;;  %v714_v57 = vshrl.u32 %v1063_v45, 16  ;;  %v717_v58 = vshll.u32 %v1063_v45, 16  ;;  %v728_v59 = vshrl.u32 %v1065_v46, 16 }
  0x34   : > { %v712_v51 = vsel %vm1199_vm3, %v707_v41, %v711_v39  ;;  %v731_v60 = vshll.u32 %v1065_v46, 16  ;;  %v445_v61 = vpack.c.b16 %v440_v48, %v439_v47  ;;  %v756_v62 = vunpack.c.l.b16 %v698_v49 }
  0x35   : > { %v406_v1 = vshll.u32 %v306_v52, 16  ;;  %v757_v2 = vunpack.c.l.b16 %v712_v51  ;;  %v403_v5 = vor.u32 %v402_v53, %v399_v50  ;;  %v417_v6 = vor.u32 %v416_v55, %v413_v54 }
  0x36   : > { %v420_v7 = vshll.u32 %v308_v56, 16  ;;  %v716_v9 = vrot.slane %v714_v57, 4  ;;  %v719_v10 = vrot.slane %v717_v58, 5  ;;  %v730_v11 = vrot.slane %v728_v59, 4 }
  0x37   : > { %v733_v12 = vrot.slane %v731_v60, 5  ;;  %v1042_v14 = vor.u32 %v1089_v0, %v1041_v63  ;;  %v998_v15 = vor.u32 %v1083_v4, %v997_v3  ;;  %v408_v16 = vrot.slane %v406_v1, 5 }
  0x38   : > { %v762_v17 = vpack.c.b16 %v757_v2, %v756_v62  ;;  %v404_v18 = vrot.slane %v403_v5, 4  ;;  %v422_v19 = vrot.slane %v420_v7, 5  ;;  %v723_v20 = vshll.u32 %v1064_v8, 16 }
  0x39   : > { %v418_v21 = vrot.slane %v417_v6, 4  ;;  %v720_v22 = vor.u32 %v719_v10, %v716_v9  ;;  %v734_v23 = vor.u32 %v733_v12, %v730_v11  ;;  %v737_v24 = vshll.u32 %v1066_v13, 16 }
  0x3a   : > { %v409_v25 = vsel %vm1199_vm3, %v404_v18, %v408_v16  ;;  %v725_v26 = vrot.slane %v723_v20, 5 }
  0x3b   : > { %v423_v27 = vsel %vm1199_vm3, %v418_v21, %v422_v19  ;;  %v721_v28 = vrot.slane %v720_v22, 4  ;;  %v735_v29 = vrot.slane %v734_v23, 4  ;;  %v739_v30 = vrot.slane %v737_v24, 5 }
  0x3c   : > { %v441_v31 = vunpack.c.l.b16 %v409_v25  ;;  %v442_v32 = vunpack.c.l.b16 %v423_v27 }
  0x3d   : > { %v726_v33 = vsel %vm1199_vm3, %v721_v28, %v725_v26  ;;  %v740_v34 = vsel %vm1199_vm3, %v735_v29, %v739_v30 }
  0x3e   : > { %v446_v36 = vpack.c.b16 %v442_v32, %v441_v31  ;;  %v758_v37 = vunpack.c.l.b16 %v726_v33  ;;  %v759_v38 = vunpack.c.l.b16 %v740_v34 }
  0x3f   : > { %1015 = vmatmul.msk.bf16.gmra.mxu1 %vm235_vm0, %v445_v61 }
  0x40   : > { %v763_v39 = vpack.c.b16 %v759_v38, %v758_v37 }
  0x42   : > { %1050 = vmatmul.msk.bf16.gmra.mxu2 %vm235_vm0, %v1042_v14 }
  0x43   : > { %1075 = vmatmul.msk.bf16.gmra.mxu3 %vm235_vm0, %v762_v17  ;;  %1006 = vmatmul.msk.bf16.gmra.mxu0 %vm235_vm0, %v998_v15 }
  0x4f   : > { %1016 = vmatmul.msk.bf16.gmra.mxu1 %vm235_vm0, %v446_v36 }
  0x53   : > { %1076 = vmatmul.msk.bf16.gmra.mxu3 %vm235_vm0, %v763_v39 }
  0x90   : > { %v257_v40 = vpop.f32.mrf.mxu0 }
  0x95   : > { %v577_v41 = vpop.f32.mrf.mxu2 }
  0x98   : > { %v259_v43 = vpop.f32.mrf.mxu0 }
  0x9c   : > { %v474_v42 = vpop.f32.mrf.mxu1 }
  0x9d   : > { %v579_v44 = vpop.f32.mrf.mxu2  ;;  %v494_v48 = vadd.f32 %v474_v42, %v257_v40 }
  0x9f   : > { %v597_v50 = vadd.f32 %v577_v41, %v494_v48 }
  0xa0   : > { %v262_v47 = vpop.f32.mrf.mxu0 }
  0xa4   : > { %v476_v45 = vpop.f32.mrf.mxu1 }
  0xa5   : > { %v495_v35 = vadd.f32 %v476_v45, %v259_v43  ;;  %v582_v49 = vpop.f32.mrf.mxu2 }
  0xa6   : > { %v791_v46 = vpop.f32.mrf.mxu3 }
  0xa7   : > { %v598_v52 = vadd.f32 %v579_v44, %v495_v35  ;;  %v811_v54 = vadd.f32 %v791_v46, %v597_v50 }
  0xa8   : > { %v264_v56 = vpop.f32.mrf.mxu0 }
  0xa9   : > { %v864_v25 = vmul.f32 %v811_v54, %v811_v54 }
  0xac   : > { %v479_v51 = vpop.f32.mrf.mxu1 }
  0xad   : > { %v584_v58 = vpop.f32.mrf.mxu2  ;;  %v496_v61 = vadd.f32 %v479_v51, %v262_v47 }
  0xae   : > { %v793_v53 = vpop.f32.mrf.mxu3 }
  0xaf   : > { %v812_v55 = vadd.f32 %v793_v53, %v598_v52  ;;  %v599_v0 = vadd.f32 %v582_v49, %v496_v61 }
  0xb0   : > { %v267_v63 = vpop.f32.mrf.mxu0 }
  0xb1   : > { %v1095_v57 = vpack.c.bf16 %v812_v55, %v811_v54  ;;  %v865_v23 = vmul.f32 %v812_v55, %v812_v55  ;;  %v851_v27 = vadd.f32 %v812_v55, %v811_v54 }
  0xb3   : > { %1096 = vst [vmem:[%s1289_s29] sm:$0xff] %v1095_v57   ;;  %v872_v29 = vadd.f32 %v865_v23, %v864_v25 }
  0xb4   : > { %v481_v59 = vpop.f32.mrf.mxu1 }
  0xb5   : > { %v497_v62 = vadd.f32 %v481_v59, %v264_v56  ;;  %v587_v3 = vpop.f32.mrf.mxu2 }
  0xb6   : > { %v796_v60 = vpop.f32.mrf.mxu3 }
  0xb7   : > { %v600_v2 = vadd.f32 %v584_v58, %v497_v62  ;;  %v813_v5 = vadd.f32 %v796_v60, %v599_v0 }
  0xb8   : > { %v269_v8 = vpop.f32.mrf.mxu0 }
  0xb9   : > { %v866_v26 = vmul.f32 %v813_v5, %v813_v5  ;;  %v852_v32 = vadd.f32 %v851_v27, %v813_v5 }
  0xbb   : > { %v873_v34 = vadd.f32 %v872_v29, %v866_v26 }
  0xbc   : > { %v484_v1 = vpop.f32.mrf.mxu1 }
  0xbd   : > { %v498_v11 = vadd.f32 %v484_v1, %v267_v63  ;;  %v589_v12 = vpop.f32.mrf.mxu2 }
  0xbe   : > { %v798_v4 = vpop.f32.mrf.mxu3 }
  0xbf   : > { %v814_v6 = vadd.f32 %v798_v4, %v600_v2  ;;  %v601_v14 = vadd.f32 %v587_v3, %v498_v11 }
  0xc0   : > { %v272_v17 = vpop.f32.mrf.mxu0 }
  0xc1   : > { %v1100_v7 = vpack.c.bf16 %v814_v6, %v813_v5  ;;  %v867_v33 = vmul.f32 %v814_v6, %v814_v6  ;;  %v853_v37 = vadd.f32 %v852_v32, %v814_v6 }
  0xc3   : > { %1112 = vst [vmem:[%s1289_s29 + $0x8] sm:$0xff] %v1100_v7   ;;  %v874_v41 = vadd.f32 %v873_v34, %v867_v33 }
  0xc4   : > { %v486_v9 = vpop.f32.mrf.mxu1 }
  0xc5   : > { %v499_v13 = vadd.f32 %v486_v9, %v269_v8  ;;  %v592_v24 = vpop.f32.mrf.mxu2 }
  0xc6   : > { %v801_v10 = vpop.f32.mrf.mxu3 }
  0xc7   : > { %v602_v16 = vadd.f32 %v589_v12, %v499_v13  ;;  %v815_v19 = vadd.f32 %v801_v10, %v601_v14 }
  0xc8   : > { %v274_v36 = vpop.f32.mrf.mxu0 }
  0xc9   : > { %v868_v38 = vmul.f32 %v815_v19, %v815_v19  ;;  %v854_v42 = vadd.f32 %v853_v37, %v815_v19 }
  0xcb   : > { %v875_v45 = vadd.f32 %v874_v41, %v868_v38 }
  0xcc   : > { %v489_v15 = vpop.f32.mrf.mxu1 }
  0xcd   : > { %v500_v22 = vadd.f32 %v489_v15, %v272_v17  ;;  %v594_v44 = vpop.f32.mrf.mxu2 }
  0xce   : > { %v803_v18 = vpop.f32.mrf.mxu3 }
  0xcf   : > { %v816_v20 = vadd.f32 %v803_v18, %v602_v16  ;;  %v603_v28 = vadd.f32 %v592_v24, %v500_v22 }
  0xd1   : > { %v1105_v21 = vpack.c.bf16 %v816_v20, %v815_v19  ;;  %v869_v43 = vmul.f32 %v816_v20, %v816_v20  ;;  %v855_v46 = vadd.f32 %v854_v42, %v816_v20 }
  0xd3   : > { %1113 = vst [vmem:[%s1289_s29 + $0x10] sm:$0xff] %v1105_v21   ;;  %v876_v49 = vadd.f32 %v875_v45, %v869_v43 }
  0xd4   : > { %v491_v31 = vpop.f32.mrf.mxu1 }
  0xd5   : > { %v501_v40 = vadd.f32 %v491_v31, %v274_v36 }
  0xd6   : > { %v806_v30 = vpop.f32.mrf.mxu3 }
  0xd7   : > { %v817_v39 = vadd.f32 %v806_v30, %v603_v28  ;;  %v604_v48 = vadd.f32 %v594_v44, %v501_v40 }
  0xd9   : > { %v870_v47 = vmul.f32 %v817_v39, %v817_v39  ;;  %v856_v50 = vadd.f32 %v855_v46, %v817_v39 }
  0xdb   : > { %v877_v52 = vadd.f32 %v876_v49, %v870_v47 }
  0xde   : > { %v808_v35 = vpop.f32.mrf.mxu3 }
  0xdf   : > { %v818_v51 = vadd.f32 %v808_v35, %v604_v48 }
  0xe1   : > { %v1110_v53 = vpack.c.bf16 %v818_v51, %v817_v39  ;;  %v857_v54 = vadd.f32 %v856_v50, %v818_v51  ;;  %v871_v55 = vmul.f32 %v818_v51, %v818_v51 }
  0xe3   : > { %1114 = vst [vmem:[%s1289_s29 + $0x18] sm:$0xff] %v1110_v53   ;;  %v858_v56 = vrot.slane %v857_v54, 4  ;;  %v878_v57 = vadd.f32 %v877_v52, %v871_v55 }
  0xe5   : > { %v859_v58 = vadd.f32 %v858_v56, %v857_v54  ;;  %v879_v59 = vrot.slane %v878_v57, 4 }
  0xe7   : > { %v860_v60 = vrot.slane %v859_v58, 2  ;;  %v880_v61 = vadd.f32 %v879_v59, %v878_v57 }
  0xe9   : > { %v861_v62 = vadd.f32 %v860_v60, %v859_v58  ;;  %v881_v63 = vrot.slane %v880_v61, 2 }
  0xeb   : > { %v862_v0 = vrot.slane %v861_v62, 1  ;;  %v882_v1 = vadd.f32 %v881_v63, %v880_v61 }
  0xed   : > { %v883_v2 = vrot.slane %v882_v1, 1  ;;  %v863_v3 = vadd.f32 %v862_v0, %v861_v62 }
  0xef   : > { %v884_v4 = vadd.f32 %v883_v2, %v882_v1 }
  0xf1   : > { %v886_v5 = vsel %vm885_vm4, %v863_v3, %v884_v4 }
  0xf2   : > { %887 = vst [vmem:[%s181_s6] sm:$0x3] %v886_v5 }
  0xf3 PF: > { %s14_s12 = sadd.s32 1, %s1130_s12  }
  0xf4   : > { %p11_p4 = scmp.ge.s32.totalorder %s14_s12, 4  }
  0xf6   :  { %13 = sbr.rel (!%p11_p4) target bundleno = 1 (0x1), region = 74 }

</bundles_post_ra>
